<compile_context>
chip_gen: v7x
topology: tpu7x:2x2x1
jax: 0.10.0
libtpu: 0.0.40
codegen_flags: <defaults>
</compile_context>

<pallas_src>
import numpy as np
import jax
import jax.numpy as jnp
from jax.experimental import pallas as pl
from jax.experimental.pallas import tpu as pltpu

B = 2                          # test batch
CIN, H, W = 1, 8, 8
COUT, K = 32, 5
OH = OW = H - K + 1            # 4
PH = PW = OH // 2              # 2 (after 2x2 max pool)
FC_IN = COUT * PH * PW         # 128
FC_OUT = 136
FC_OUT_PAD = 256               # lane-dense padded output width
NPIX = CIN * H * W             # 64


def _round_up(a, b):
    return (a + b - 1) // b * b


# ---------------------------------------------------------------------------
# One-time constants (pure numpy).
# ---------------------------------------------------------------------------
def _build_selector():
    """S[p, s*PH*PW + q, kh*K + kw] = 1 where p = ih*W + iw,
       ih = 2*ph + dh + kh, iw = 2*pw + dw + kw, s = dh*2 + dw, q = ph*PW + pw."""
    S = np.zeros((NPIX, 4 * PH * PW, K * K), np.float32)
    for dh in range(2):
        for dw in range(2):
            s = dh * 2 + dw
            for ph in range(PH):
                for pw in range(PW):
                    q = ph * PW + pw
                    for kh in range(K):
                        for kw in range(K):
                            ih = 2 * ph + dh + kh
                            iw = 2 * pw + dw + kw
                            S[ih * W + iw, s * PH * PW + q, kh * K + kw] = 1.0
    return S


# Row permutation for the FC weight: pooled layout index j = q*COUT + c corresponds to
# PyTorch NCHW-flatten index c*(PH*PW) + q.
_FC_PERM = np.array(
    [c * (PH * PW) + q for q in range(PH * PW) for c in range(COUT)], np.int32)

_SEL = jnp.asarray(_build_selector())          # (64, 16, 25) constant


# ---------------------------------------------------------------------------
# One-time parameter preparation (hoisted out of the forward pass).
# ---------------------------------------------------------------------------
def prepare_params(conv_w, conv_b, fc_w, fc_b, *, compute_dtype=jnp.bfloat16):
    """Fold conv into a dense (64, 512) matmul weight, permute + pad the FC weight.
    Call ONCE; the returned dict is reused for every forward call."""
    wck = conv_w.reshape(COUT, K * K).T                                 # (25, 32)
    w_exp = jnp.einsum('pqk,kc->pqc', _SEL, wck).reshape(NPIX, 4 * FC_IN)  # (64, 512)
    bc = jnp.tile(conv_b, PH * PW).reshape(1, FC_IN).astype(jnp.float32)   # (1, 128)
    wf = fc_w.T[_FC_PERM, :]                                            # (128, 136)
    wf_pad = jnp.zeros((FC_IN, FC_OUT_PAD), jnp.float32).at[:, :FC_OUT].set(wf)
    bf_pad = jnp.zeros((1, FC_OUT_PAD), jnp.float32).at[:, :FC_OUT].set(
        fc_b.reshape(1, FC_OUT))
    return {
        "w_exp": w_exp.astype(compute_dtype),   # MXU operand dtype
        "bc": bc,                               # bias stays f32 (VPU domain)
        "wf": wf_pad.astype(compute_dtype),
        "bf": bf_pad,
    }


# ---------------------------------------------------------------------------
# Single fused kernel: conv-matmul + maxpool + bias + ReLU + Linear + bias + ReLU
# ---------------------------------------------------------------------------
def fused_net_kernel(x_ref, wexp_ref, bc_ref, wf_ref, bf_ref, o_ref):
    # x_ref:    (TM, 64)        flattened input images (batch tile)
    # wexp_ref: (64, 512)       conv weight expanded to dense matmul form
    # bc_ref:   (1, 128)  f32   conv bias tiled over pool positions (q, c) layout
    # wf_ref:   (128, 256)      fc weight, rows permuted, lanes zero-padded 136->256
    # bf_ref:   (1, 256)  f32   fc bias, zero-padded
    # o_ref:    (TM, 256) f32
    y = jnp.dot(x_ref[...], wexp_ref[...],
                preferred_element_type=jnp.float32)                    # (TM, 512) f32
    # 2x2 max-pool: elementwise max over the 4 lane-aligned 128-wide offset slabs.
    pooled = jnp.maximum(
        jnp.maximum(y[:, 0 * FC_IN:1 * FC_IN], y[:, 1 * FC_IN:2 * FC_IN]),
        jnp.maximum(y[:, 2 * FC_IN:3 * FC_IN], y[:, 3 * FC_IN:4 * FC_IN]),
    )                                                                  # (TM, 128) f32
    # bias + ReLU commute with the pool max (bias uniform over offsets, ReLU monotone)
    h = jnp.maximum(pooled + bc_ref[...], 0.0)                         # (TM, 128) f32
    h = h.astype(wf_ref.dtype)                                         # cast only at dot
    o_ref[...] = jnp.maximum(
        jnp.dot(h, wf_ref[...], preferred_element_type=jnp.float32) + bf_ref[...],
        0.0,
    )


def net_forward(params, x):
    """x: (B, 1, 8, 8) f32 NCHW.  Returns (B, 136) f32."""
    w_exp, bc, wf, bf = params["w_exp"], params["bc"], params["wf"], params["bf"]
    cdt = w_exp.dtype
    itemsize = cdt.itemsize
    bsz = x.shape[0]

    x_flat = x.reshape(bsz, NPIX).astype(cdt)                          # (B, 64)

    # Batch tiling: 8-aligned, large M tiles to fill MXU rows / amortize grid overhead.
    tm_target = 512 if cdt == jnp.bfloat16 else 256
    tm = min(tm_target, _round_up(bsz, 8))
    b_pad = _round_up(bsz, tm)
    if b_pad != bsz:
        x_flat = jnp.pad(x_flat, ((0, b_pad - bsz), (0, 0)))
    grid = (b_pad // tm,)

    flops = 2 * b_pad * (NPIX * 4 * FC_IN + FC_IN * FC_OUT_PAD)
    bytes_accessed = int(
        b_pad * NPIX * itemsize                 # x
        + NPIX * 4 * FC_IN * itemsize           # w_exp
        + FC_IN * 4                             # bc
        + FC_IN * FC_OUT_PAD * itemsize         # wf
        + FC_OUT_PAD * 4                        # bf
        + b_pad * FC_OUT_PAD * 4)               # out

    out = pl.pallas_call(
        fused_net_kernel,
        out_shape=jax.ShapeDtypeStruct((b_pad, FC_OUT_PAD), jnp.float32),
        grid=grid,
        in_specs=[
            pl.BlockSpec((tm, NPIX), lambda i: (i, 0)),            # batch-tiled input
            pl.BlockSpec((NPIX, 4 * FC_IN), lambda i: (0, 0)),     # weights stay resident
            pl.BlockSpec((1, FC_IN), lambda i: (0, 0)),
            pl.BlockSpec((FC_IN, FC_OUT_PAD), lambda i: (0, 0)),
            pl.BlockSpec((1, FC_OUT_PAD), lambda i: (0, 0)),
        ],
        out_specs=pl.BlockSpec((tm, FC_OUT_PAD), lambda i: (i, 0)),
        compiler_params=pltpu.CompilerParams(
            dimension_semantics=("parallel",)),                    # shards over v7x 2 TCs
        cost_estimate=pl.CostEstimate(
            flops=flops, transcendentals=0, bytes_accessed=bytes_accessed),
    )(x_flat, w_exp, bc, wf, bf)

    return out[:bsz, :FC_OUT]


def reference(x, conv_w, conv_b, fc_w, fc_b):
    """Pure-JAX reference identical to the PyTorch forward."""
    y = jax.lax.conv_general_dilated(
        x, conv_w, window_strides=(1, 1), padding="VALID",
        dimension_numbers=("NCHW", "OIHW", "NCHW"))
    y = jnp.maximum(y + conv_b[None, :, None, None], 0.0)
    y = y.reshape(x.shape[0], COUT, PH, 2, PW, 2).max(axis=(3, 5))  # MaxPool2d(2,2)
    y = y.reshape(x.shape[0], -1)                                   # NCHW flatten
    return jnp.maximum(y @ fc_w.T + fc_b, 0.0)


if __name__ == "__main__":
    key = jax.random.PRNGKey(0)
    k_x, k_cw, k_cb, k_fw, k_fb = jax.random.split(key, 5)

    # Deterministic "PyTorch-default-like" uniform init.
    conv_bound = 1.0 / (CIN * K * K) ** 0.5
    fc_bound = 1.0 / FC_IN ** 0.5
    conv_w = jax.random.uniform(k_cw, (COUT, CIN, K, K), jnp.float32,
                                -conv_bound, conv_bound)
    conv_b = jax.random.uniform(k_cb, (COUT,), jnp.float32, -conv_bound, conv_bound)
    fc_w = jax.random.uniform(k_fw, (FC_OUT, FC_IN), jnp.float32, -fc_bound, fc_bound)
    fc_b = jax.random.uniform(k_fb, (FC_OUT,), jnp.float32, -fc_bound, fc_bound)

    x = jax.random.normal(k_x, (B, CIN, H, W), jnp.float32)

    ref = jax.block_until_ready(reference(x, conv_w, conv_b, fc_w, fc_b))
    fwd = jax.jit(net_forward)

    # f32 operand path (exact check) — params prepared ONCE, reused per call.
    params_f32 = jax.tree_util.tree_map(
        jax.block_until_ready,
        prepare_params(conv_w, conv_b, fc_w, fc_b, compute_dtype=jnp.float32))
    out_f32 = jax.block_until_ready(fwd(params_f32, x))
    assert out_f32.shape == (B, FC_OUT)
    assert jnp.allclose(out_f32, ref, atol=1e-4, rtol=1e-4), "f32 mismatch vs reference"

    # bf16 MXU-operand path (v5e/v6e/v7x throughput config) — looser tolerance.
    params_bf16 = jax.tree_util.tree_map(
        jax.block_until_ready,
        prepare_params(conv_w, conv_b, fc_w, fc_b, compute_dtype=jnp.bfloat16))
    out_bf16 = jax.block_until_ready(fwd(params_bf16, x))
    assert out_bf16.shape == (B, FC_OUT)
    assert jnp.allclose(out_bf16, ref, atol=5e-2, rtol=5e-2), "bf16 mismatch vs reference"

    print("KERNEL_OK")
</pallas_src>

<mosaic_0001>
module attributes {stable_mosaic.version = 11 : i64} {
  func.func @fused_net_kernel(%arg0: i32, %arg1: memref<8x64xf32, #tpu.memory_space<vmem>>, %arg2: memref<64x512xf32, #tpu.memory_space<vmem>>, %arg3: memref<1x128xf32, #tpu.memory_space<vmem>>, %arg4: memref<128x256xf32, #tpu.memory_space<vmem>>, %arg5: memref<1x256xf32, #tpu.memory_space<vmem>>, %arg6: memref<8x256xf32, #tpu.memory_space<vmem>>) attributes {dimension_semantics = [#tpu.dimension_semantics<parallel>], iteration_bounds = array<i64: 1>, scalar_prefetch = 0 : i64, scratch_operands = 0 : i64, tpu.core_type = #tpu.core_type<tc>, window_params = [{transform_indices = @transform_0, window_bounds = array<i64: 8, 64>}, {pipeline_mode = #tpu.pipeline_mode<synchronous>, transform_indices = @transform_1, window_bounds = array<i64: 64, 512>}, {pipeline_mode = #tpu.pipeline_mode<synchronous>, transform_indices = @transform_2, window_bounds = array<i64: 1, 128>}, {pipeline_mode = #tpu.pipeline_mode<synchronous>, transform_indices = @transform_3, window_bounds = array<i64: 128, 256>}, {pipeline_mode = #tpu.pipeline_mode<synchronous>, transform_indices = @transform_4, window_bounds = array<i64: 1, 256>}, {transform_indices = @transform_5, window_bounds = array<i64: 8, 256>}]} {
    %c0 = arith.constant 0 : index
    %c0_0 = arith.constant 0 : index
    %0 = vector.load %arg1[%c0, %c0_0] : memref<8x64xf32, #tpu.memory_space<vmem>>, vector<8x64xf32>
    %c0_1 = arith.constant 0 : index
    %c0_2 = arith.constant 0 : index
    %1 = vector.load %arg2[%c0_1, %c0_2] : memref<64x512xf32, #tpu.memory_space<vmem>>, vector<64x512xf32>
    %cst = arith.constant dense<0.000000e+00> : vector<8x512xf32>
    %2 = tpu.matmul %0, %1, %cst {dimension_numbers = #tpu.dot_dimension_numbers<[1], [0], [0], [1], [0, 0, 1, 1], [], []>} : vector<8x64xf32>, vector<64x512xf32>, vector<8x512xf32> -> vector<8x512xf32>
    %3 = vector.extract_strided_slice %2 {offsets = [0, 0], sizes = [8, 128], strides = [1, 1]} : vector<8x512xf32> to vector<8x128xf32>
    %4 = vector.extract_strided_slice %2 {offsets = [0, 128], sizes = [8, 128], strides = [1, 1]} : vector<8x512xf32> to vector<8x128xf32>
    %5 = arith.maximumf %3, %4 : vector<8x128xf32>
    %6 = vector.extract_strided_slice %2 {offsets = [0, 256], sizes = [8, 128], strides = [1, 1]} : vector<8x512xf32> to vector<8x128xf32>
    %7 = vector.extract_strided_slice %2 {offsets = [0, 384], sizes = [8, 128], strides = [1, 1]} : vector<8x512xf32> to vector<8x128xf32>
    %8 = arith.maximumf %6, %7 : vector<8x128xf32>
    %9 = arith.maximumf %5, %8 : vector<8x128xf32>
    %c0_3 = arith.constant 0 : index
    %c0_4 = arith.constant 0 : index
    %10 = vector.load %arg3[%c0_3, %c0_4] : memref<1x128xf32, #tpu.memory_space<vmem>>, vector<1x128xf32>
    %11 = vector.broadcast %10 : vector<1x128xf32> to vector<8x128xf32>
    %12 = arith.addf %9, %11 : vector<8x128xf32>
    %cst_5 = arith.constant 0.000000e+00 : f32
    %13 = vector.broadcast %cst_5 : f32 to vector<8x128xf32>
    %14 = arith.maximumf %12, %13 : vector<8x128xf32>
    %c0_6 = arith.constant 0 : index
    %c0_7 = arith.constant 0 : index
    %15 = vector.load %arg4[%c0_6, %c0_7] : memref<128x256xf32, #tpu.memory_space<vmem>>, vector<128x256xf32>
    %cst_8 = arith.constant dense<0.000000e+00> : vector<8x256xf32>
    %16 = tpu.matmul %14, %15, %cst_8 {dimension_numbers = #tpu.dot_dimension_numbers<[1], [0], [0], [1], [0, 0, 1, 1], [], []>} : vector<8x128xf32>, vector<128x256xf32>, vector<8x256xf32> -> vector<8x256xf32>
    %c0_9 = arith.constant 0 : index
    %c0_10 = arith.constant 0 : index
    %17 = vector.load %arg5[%c0_9, %c0_10] : memref<1x256xf32, #tpu.memory_space<vmem>>, vector<1x256xf32>
    %18 = vector.broadcast %17 : vector<1x256xf32> to vector<8x256xf32>
    %19 = arith.addf %16, %18 : vector<8x256xf32>
    %cst_11 = arith.constant 0.000000e+00 : f32
    %20 = vector.broadcast %cst_11 : f32 to vector<8x256xf32>
    %21 = arith.maximumf %19, %20 : vector<8x256xf32>
    %c0_12 = arith.constant 0 : index
    %c0_13 = arith.constant 0 : index
    %22 = vector.load %arg6[%c0_12, %c0_13] : memref<8x256xf32, #tpu.memory_space<vmem>>, vector<8x256xf32>
    tpu.vector_store %arg6[%c0_12, %c0_13], %21 {strides = array<i32>} : memref<8x256xf32, #tpu.memory_space<vmem>>, vector<8x256xf32>,
    return
  }
  func.func @transform_0(%arg0: i32) -> (i32, i32) {
    %c0_i32 = arith.constant 0 : i32
    %c0_i32_0 = arith.constant 0 : i32
    return %arg0, %c0_i32 : i32, i32
  }
  func.func @transform_1(%arg0: i32) -> (i32, i32) {
    %c0_i32 = arith.constant 0 : i32
    %c0_i32_0 = arith.constant 0 : i32
    %c0_i32_1 = arith.constant 0 : i32
    return %c0_i32, %c0_i32_0 : i32, i32
  }
  func.func @transform_2(%arg0: i32) -> (i32, i32) {
    %c0_i32 = arith.constant 0 : i32
    %c0_i32_0 = arith.constant 0 : i32
    %c0_i32_1 = arith.constant 0 : i32
    return %c0_i32, %c0_i32_0 : i32, i32
  }
  func.func @transform_3(%arg0: i32) -> (i32, i32) {
    %c0_i32 = arith.constant 0 : i32
    %c0_i32_0 = arith.constant 0 : i32
    %c0_i32_1 = arith.constant 0 : i32
    return %c0_i32, %c0_i32_0 : i32, i32
  }
  func.func @transform_4(%arg0: i32) -> (i32, i32) {
    %c0_i32 = arith.constant 0 : i32
    %c0_i32_0 = arith.constant 0 : i32
    %c0_i32_1 = arith.constant 0 : i32
    return %c0_i32, %c0_i32_0 : i32, i32
  }
  func.func @transform_5(%arg0: i32) -> (i32, i32) {
    %c0_i32 = arith.constant 0 : i32
    %c0_i32_0 = arith.constant 0 : i32
    return %arg0, %c0_i32 : i32, i32
  }
}

</mosaic_0001>

<bundles_post_ra>
// kernel: net_forward.1
= control target key start
LH: loop header
LB: loop body
LE: loop exit
PB: predicated region body
PF: predicated region fallthrough
CT: control target
= control target key end

     0   :  { %10 = vsyncpa [#allocation3], 0  ;;  %s567_s0 = inlined_call_operand.vmem [shape: f32[8,64], index: 0, kind: input, shape index: {}]   ;;  %s568_s1 = inlined_call_operand.hbm [shape: f32[64,512], index: 1, kind: input, shape index: {}]   ;;  %s569_s2 = inlined_call_operand.vmem [shape: f32[1,128], index: 2, kind: input, shape index: {}]   ;;  %s570_s3 = inlined_call_operand.hbm [shape: f32[128,256], index: 3, kind: input, shape index: {}]   ;;  %s571_s4 = inlined_call_operand.vmem [shape: f32[1,256], index: 4, kind: input, shape index: {}]   ;;  %s572_s5 = inlined_call_operand.vmem [shape: f32[8,256], index: 5, kind: output, shape index: {}]  }
   0x1   :  { %11 = vsyncpa [#allocation5], 0  ;;  %s486_s18 = smov [#allocation2]   ;;  %s438_s22 = scalar_lea.hbm %s568_s1, 4096 }
   0x2   :  { %s19_s19 = sshll.u32 %s486_s18, 4  ;;  %p439_p0 = scmp.ne.s32.totalorder %s568_s1, %s438_s22  ;;  %s20_s19 = int_to_ptr.vmem [resolvable:$true] %s19_s19 }
   0x3   :  { %p442_p1 = scmp.lt.u32.totalorder %s438_s22, %s568_s1 }
   0x5   :  { %p444_p2 = pnand %p442_p1, %p439_p0 }
   0x7   :  { %447 = shalt.err (!%p444_p2)
}
   0x8   :  { %s448_s27 = scalar_lea.vmem %s20_s19, 4096  ;;  %p453_p4 = scmp.lt.s32.totalorder %s20_s19, %s20_s19 }
   0x9   :  { %p449_p3 = scmp.ne.s32.totalorder %s20_s19, %s448_s27  ;;  %p454_p5 = scmp.lt.s32.totalorder %s448_s27, %s448_s27 }
   0xb   :  { %p455_p6 = por %p454_p5, %p453_p4 }
   0xd   :  { %p456_p7 = pnand %p455_p6, %p449_p3 }
   0xf   :  { %459 = shalt.err (!%p456_p7)
}
  0x10   :  { %s487_s28 = smov 512   ;;  %s488_s29 = smov 32  }
  0x11   :  { %25 = dma.hbm_to_vmem [thread:$0]  %s568_s1, 4096, %s20_s19, [#allocation3], %s487_s28, %s487_s28, %s488_s29  }
  0x12   :  { %s489_s7 = smov [#allocation4]   ;;  %s460_s11 = scalar_lea.hbm %s570_s3, 4096 }
  0x13   :  { %s33_s8 = sshll.u32 %s489_s7, 4  ;;  %p461_p8 = scmp.ne.s32.totalorder %s570_s3, %s460_s11  ;;  %s34_s8 = int_to_ptr.vmem [resolvable:$true] %s33_s8 }
  0x14   :  { %p464_p9 = scmp.lt.u32.totalorder %s460_s11, %s570_s3 }
  0x16   :  { %p466_p10 = pnand %p464_p9, %p461_p8 }
  0x18   :  { %469 = shalt.err (!%p466_p10)
}
  0x19   :  { %s470_s16 = scalar_lea.vmem %s34_s8, 4096  ;;  %p475_p12 = scmp.lt.s32.totalorder %s34_s8, %s34_s8 }
  0x1a   :  { %p471_p11 = scmp.ne.s32.totalorder %s34_s8, %s470_s16  ;;  %p476_p13 = scmp.lt.s32.totalorder %s470_s16, %s470_s16 }
  0x1c   :  { %p477_p0 = por %p476_p13, %p475_p12 }
  0x1e   :  { %p478_p1 = pnand %p477_p0, %p471_p11 }
  0x20   :  { %481 = shalt.err (!%p478_p1)
}
  0x21   :  { %s490_s1 = smov 256   ;;  %s491_s17 = smov 16  }
  0x22   :  { %39 = dma.hbm_to_vmem [thread:$0]  %s570_s3, 4096, %s34_s8, [#allocation5], %s490_s1, %s490_s1, %s491_s17  }
  0x23   :  { %482 = dma.done.wait [#allocation3], 4096  }
  0x24   :  { %483 = vsyncadd [#allocation3], 4294963200 }
  0x25   :  { %484 = dma.done.wait [#allocation5], 4096  }
  0x26   :  { %485 = vsyncadd [#allocation5], 4294963200  ;;  %v492_v0 = vmov 0.0   ;;  %v50_v1 = vld [vmem:[#allocation2 + $0x8] sm:$0xff]  ;;  %v49_v3 = vld [vmem:[#allocation2] sm:$0xff]  ;;  %vm81_vm0 = vcmask 523264  }
  0x27   :  { %149 = vmatprep.mubr.f32.mxu1 %v492_v0  ;;  %347 = vmatprep.mubr.f32.mxu0 %v492_v0  ;;  %v54_v2 = vld [vmem:[#allocation2 + $0x28] sm:$0xff]  ;;  %v53_v5 = vld [vmem:[#allocation2 + $0x20] sm:$0xff]  ;;  %v52_v24 = vld [vmem:[#allocation2 + $0x18] sm:$0xff] }
  0x28   :  { %v367_v4 = vpack.c.bf16 %v54_v2, %v50_v1  ;;  %v58_v6 = vld [vmem:[#allocation2 + $0x48] sm:$0xff]  ;;  %v369_v8 = vpack.c.bf16 %v53_v5, %v49_v3  ;;  %v57_v10 = vld [vmem:[#allocation2 + $0x40] sm:$0xff]  ;;  %v56_v25 = vld [vmem:[#allocation2 + $0x38] sm:$0xff] }
  0x29   :  { %v62_v7 = vld [vmem:[#allocation2 + $0x68] sm:$0xff]  ;;  %v61_v11 = vld [vmem:[#allocation2 + $0x60] sm:$0xff]  ;;  %v51_v26 = vld [vmem:[#allocation2 + $0x10] sm:$0xff]  ;;  %v383_v35 = vpack.c.bf16 %v56_v25, %v52_v24 }
  0x2a   :  { %v371_v9 = vpack.c.bf16 %v62_v7, %v58_v6  ;;  %v66_v12 = vld [vmem:[#allocation2 + $0x88] sm:$0xff]  ;;  %368 = vmatprep.subr.bf16.mxu1 %v367_v4  ;;  %v373_v14 = vpack.c.bf16 %v61_v11, %v57_v10  ;;  %v65_v16 = vld [vmem:[#allocation2 + $0x80] sm:$0xff]  ;;  %v242_v28 = vld [vmem:[#allocation4 + $0x18] sm:$0xff] }
  0x2b   :  { %v70_v13 = vld [vmem:[#allocation2 + $0xa8] sm:$0xff]  ;;  %370 = vmatpush1.bf16.msra.mxu1 %v369_v8  ;;  %v69_v17 = vld [vmem:[#allocation2 + $0xa0] sm:$0xff]  ;;  %v241_v32 = vld [vmem:[#allocation4 + $0x10] sm:$0xff] }
  0x2c   :  { %372 = vmatprep.subr.bf16.mxu1 %v371_v9  ;;  %v375_v15 = vpack.c.bf16 %v70_v13, %v66_v12  ;;  %v74_v18 = vld [vmem:[#allocation2 + $0xc8] sm:$0xff]  ;;  %v377_v20 = vpack.c.bf16 %v69_v17, %v65_v16  ;;  %v73_v22 = vld [vmem:[#allocation2 + $0xc0] sm:$0xff]  ;;  %v246_v34 = vld [vmem:[#allocation4 + $0x38] sm:$0xff] }
  0x2d   :  { %v78_v19 = vld [vmem:[#allocation2 + $0xe8] sm:$0xff]  ;;  %v77_v23 = vld [vmem:[#allocation2 + $0xe0] sm:$0xff]  ;;  %v55_v36 = vld [vmem:[#allocation2 + $0x30] sm:$0xff] }
  0x2e   :  { %v379_v21 = vpack.c.bf16 %v78_v19, %v74_v18  ;;  %v240_v27 = vld [vmem:[#allocation4 + $0x8] sm:$0xff]  ;;  %v239_v29 = vld [vmem:[#allocation4] sm:$0xff]  ;;  %v381_v30 = vpack.c.bf16 %v77_v23, %v73_v22  ;;  %v245_v40 = vld [vmem:[#allocation4 + $0x30] sm:$0xff]  ;;  %v385_v45 = vpack.c.bf16 %v55_v36, %v51_v26 }
  0x2f   :  { %374 = vmatpush1.bf16.msra.mxu1 %v373_v14  ;;  %v399_v31 = vpack.c.bf16 %v242_v28, %v240_v27  ;;  %v244_v33 = vld [vmem:[#allocation4 + $0x28] sm:$0xff]  ;;  %v401_v37 = vpack.c.bf16 %v241_v32, %v239_v29  ;;  %v243_v39 = vld [vmem:[#allocation4 + $0x20] sm:$0xff]  ;;  %v60_v41 = vld [vmem:[#allocation2 + $0x58] sm:$0xff] }
  0x30   :  { %376 = vmatprep.subr.bf16.mxu1 %v375_v15  ;;  %v403_v38 = vpack.c.bf16 %v246_v34, %v244_v33  ;;  %v64_v42 = vld [vmem:[#allocation2 + $0x78] sm:$0xff]  ;;  %v405_v43 = vpack.c.bf16 %v245_v40, %v243_v39  ;;  %v48_v44 = vld [vmem:[%s567_s0] sm:$0xff]  ;;  %v59_v47 = vld [vmem:[#allocation2 + $0x50] sm:$0xff] }
  0x31   :  { %400 = vmatprep.subr.bf16.mxu0 %v399_v31  ;;  %v387_v46 = vpack.c.bf16 %v64_v42, %v60_v41  ;;  %v63_v48 = vld [vmem:[#allocation2 + $0x70] sm:$0xff]  ;;  %v68_v49 = vld [vmem:[#allocation2 + $0x98] sm:$0xff]  ;;  %v248_v62 = vld [vmem:[#allocation4 + $0x48] sm:$0xff] }
  0x32   :  { %402 = vmatpush1.bf16.msra.mxu0 %v401_v37  ;;  %v72_v50 = vld [vmem:[#allocation2 + $0xb8] sm:$0xff]  ;;  %v389_v51 = vpack.c.bf16 %v63_v48, %v59_v47  ;;  %v67_v53 = vld [vmem:[#allocation2 + $0x90] sm:$0xff]  ;;  %v247_v1 = vld [vmem:[#allocation4 + $0x40] sm:$0xff] }
  0x33   :  { %378 = vmatpush1.bf16.msra.mxu1 %v377_v20  ;;  %404 = vmatprep.subr.bf16.mxu0 %v403_v38  ;;  %v391_v52 = vpack.c.bf16 %v72_v50, %v68_v49  ;;  %v71_v54 = vld [vmem:[#allocation2 + $0xb0] sm:$0xff]  ;;  %v76_v55 = vld [vmem:[#allocation2 + $0xd8] sm:$0xff]  ;;  %v252_v4 = vld [vmem:[#allocation4 + $0x68] sm:$0xff] }
  0x34   :  { %380 = vmatprep.subr.bf16.mxu1 %v379_v21  ;;  %v80_v56 = vld [vmem:[#allocation2 + $0xf8] sm:$0xff]  ;;  %v393_v57 = vpack.c.bf16 %v71_v54, %v67_v53  ;;  %v75_v59 = vld [vmem:[#allocation2 + $0xd0] sm:$0xff]  ;;  %v251_v6 = vld [vmem:[#allocation4 + $0x60] sm:$0xff] }
  0x35   :  { %v395_v58 = vpack.c.bf16 %v80_v56, %v76_v55  ;;  %v79_v60 = vld [vmem:[#allocation2 + $0xf0] sm:$0xff]  ;;  %v250_v63 = vld [vmem:[#allocation4 + $0x58] sm:$0xff]  ;;  %v256_v9 = vld [vmem:[#allocation4 + $0x88] sm:$0xff] }
  0x36   :  { %406 = vmatpush1.bf16.msra.mxu0 %v405_v43  ;;  %v397_v61 = vpack.c.bf16 %v79_v60, %v75_v59  ;;  %v249_v2 = vld [vmem:[#allocation4 + $0x50] sm:$0xff]  ;;  %v254_v5 = vld [vmem:[#allocation4 + $0x78] sm:$0xff]  ;;  %v255_v13 = vld [vmem:[#allocation4 + $0x80] sm:$0xff] }
  0x37   :  { %382 = vmatpush1.bf16.msra.mxu1 %v381_v30  ;;  %v409_v3 = vpack.c.bf16 %v249_v2, %v247_v1  ;;  %v411_v7 = vpack.c.bf16 %v254_v5, %v252_v4  ;;  %v253_v8 = vld [vmem:[#allocation4 + $0x70] sm:$0xff]  ;;  %v258_v10 = vld [vmem:[#allocation4 + $0x98] sm:$0xff]  ;;  %v260_v15 = vld [vmem:[#allocation4 + $0xa8] sm:$0xff] }
  0x38   :  { %384 = vmatprep.subr.bf16.mxu1 %v383_v35  ;;  %v413_v11 = vpack.c.bf16 %v253_v8, %v251_v6  ;;  %v415_v12 = vpack.c.bf16 %v258_v10, %v256_v9  ;;  %v257_v14 = vld [vmem:[#allocation4 + $0x90] sm:$0xff]  ;;  %v262_v16 = vld [vmem:[#allocation4 + $0xb8] sm:$0xff]  ;;  %v259_v19 = vld [vmem:[#allocation4 + $0xa0] sm:$0xff] }
  0x39   :  { %v417_v17 = vpack.c.bf16 %v257_v14, %v255_v13  ;;  %v419_v18 = vpack.c.bf16 %v262_v16, %v260_v15  ;;  %v261_v20 = vld [vmem:[#allocation4 + $0xb0] sm:$0xff]  ;;  %v264_v22 = vld [vmem:[#allocation4 + $0xc8] sm:$0xff]  ;;  %v266_v23 = vld [vmem:[#allocation4 + $0xd8] sm:$0xff] }
  0x3a   :  { %364 = vmatmul.mubr.msk.f32.vlgmr.msra.gmra.mrb[0].mxu1 %vm81_vm0, %v48_v44  ;;  %v421_v21 = vpack.c.bf16 %v261_v20, %v259_v19  ;;  %v423_v24 = vpack.c.bf16 %v266_v23, %v264_v22  ;;  %v263_v25 = vld [vmem:[#allocation4 + $0xc0] sm:$0xff]  ;;  %v265_v26 = vld [vmem:[#allocation4 + $0xd0] sm:$0xff]  ;;  %v268_v28 = vld [vmem:[#allocation4 + $0xe8] sm:$0xff] }
  0x3b   :  { %386 = vmatpush1.bf16.msra.mxu1 %v385_v45  ;;  %220 = vmatprep.mubr.f32.mxu1 %v492_v0  ;;  %v407_v0 = vpack.c.bf16 %v250_v63, %v248_v62  ;;  %v425_v27 = vpack.c.bf16 %v265_v26, %v263_v25  ;;  %v270_v29 = vld [vmem:[#allocation4 + $0xf8] sm:$0xff]  ;;  %v267_v31 = vld [vmem:[#allocation4 + $0xe0] sm:$0xff]  ;;  %v269_v32 = vld [vmem:[#allocation4 + $0xf0] sm:$0xff] }
  0x3c   :  { %388 = vmatprep.subr.bf16.mxu1 %v387_v46  ;;  %v427_v30 = vpack.c.bf16 %v270_v29, %v268_v28  ;;  %v429_v33 = vpack.c.bf16 %v269_v32, %v267_v31  ;;  %v366_v40 = vld [vmem:[%s569_s2] ss:$0 sm:$0xff] }
  0x3d   :  { %408 = vmatprep.subr.bf16.mxu0 %v407_v0  ;;  %v271_v47 = vld [vmem:[%s571_s4] sm:$0x3] }
  0x3e   :  { %410 = vmatpush1.bf16.msra.mxu0 %v409_v3 }
  0x3f   :  { %390 = vmatpush1.bf16.msra.mxu1 %v389_v51  ;;  %412 = vmatprep.subr.bf16.mxu0 %v411_v7 }
  0x40   :  { %392 = vmatprep.subr.bf16.mxu1 %v391_v52 }
  0x42   :  { %414 = vmatpush1.bf16.msra.mxu0 %v413_v11 }
  0x43   :  { %394 = vmatpush1.bf16.msra.mxu1 %v393_v57  ;;  %416 = vmatprep.subr.bf16.mxu0 %v415_v12 }
  0x44   :  { %396 = vmatprep.subr.bf16.mxu1 %v395_v58 }
  0x46   :  { %418 = vmatpush1.bf16.msra.mxu0 %v417_v17 }
  0x47   :  { %398 = vmatpush1.bf16.msra.mxu1 %v397_v61  ;;  %420 = vmatprep.subr.bf16.mxu0 %v419_v18 }
  0x4a   :  { %365 = vmatmul.mubr.msk.f32.vlgmr.msra.gmra.mrb[2].mxu1 %vm81_vm0, %v48_v44  ;;  %422 = vmatpush1.bf16.msra.mxu0 %v421_v21  ;;  %v273_v44 = vlaneseq }
  0x4b   :  { %424 = vmatprep.subr.bf16.mxu0 %v423_v24 }
  0x4c   :  { %v274_v45 = vshrl.u32 %v273_v44, 7 }
  0x4e   :  { %426 = vmatpush1.bf16.msra.mxu0 %v425_v27  ;;  %v275_v46 = vsub.s32 0, %v274_v45  ;;  %v279_v48 = vsub.s32 1, %v274_v45 }
  0x4f   :  { %428 = vmatprep.subr.bf16.mxu0 %v427_v30 }
  0x50   :  { %v276_v49 = vrot.slane %v271_v47, %v275_v46  ;;  %v280_v50 = vrot.slane %v271_v47, %v279_v48 }
  0x52   :  { %430 = vmatpush1.bf16.msra.mxu0 %v429_v33 }
 0x10d   :  { %v151_v34 = vpop.f32.mrb[0].mxu1 }
 0x10e   :  { %v153_v35 = vpop.f32.mrb[1].mxu1 }
 0x10f   :  { %v227_v36 = vmax.f32 %v151_v34, %v153_v35 }
 0x11d   :  { %v222_v37 = vpop.f32.mrb[2].mxu1 }
 0x11e   :  { %v224_v38 = vpop.f32.mrb[3].mxu1 }
 0x11f   :  { %v228_v39 = vmax.f32 %v222_v37, %v224_v38 }
 0x121   :  { %v229_v41 = vmax.f32 %v227_v36, %v228_v39 }
 0x123   :  { %v237_v42 = vadd.f32 %v366_v40, %v229_v41 }
 0x125   :  { %v238_v43 = vmax.f32 %v237_v42, 0.0 }
 0x127   :  { %348 = vmatmul.mubr.f32.vlgmr.msra.gmra.mrb[0].mxu0 %v238_v43 }
 0x1fa   :  { %v349_v51 = vpop.f32.mrb[0].mxu0 }
 0x1fb   :  { %v350_v52 = vadd.f32 %v349_v51, %v276_v49  ;;  %v351_v53 = vpop.f32.mrb[1].mxu0 }
 0x1fc   :  { %v352_v54 = vadd.f32 %v351_v53, %v280_v50 }
 0x1fd   :  { %v354_v55 = vmax.f32 %v350_v52, 0.0 }
 0x1fe   :  { %v355_v56 = vmax.f32 %v352_v54, 0.0 }
 0x1ff   :  { %356 = vst [vmem:[%s572_s5] sm:$0xff] %v354_v55 }
 0x200   :  { %357 = vst [vmem:[%s572_s5 + $0x8] sm:$0xff] %v355_v56 }
 0x201   :  { %362 = vsyncpa [#allocation3], 1 }
 0x202   :  { %363 = vsyncpa [#allocation5], 1 }

</bundles_post_ra>
